<compile_context>
chip_gen: v5e
topology: v5e:2x2
jax: 0.10.0
libtpu: 0.0.40
codegen_flags: <defaults>
</compile_context>

<pallas_src>
import jax
import jax.numpy as jnp
from jax import lax
from jax.experimental import pallas as pl
from jax.experimental.pallas import tpu as pltpu


def _transfer_kernel(x_ref, w_ref, o_ref):
    # x_ref: (TM, C_in) bf16   w_ref: (hidden_p, C_in) bf16   o_ref: (TM, hidden_p)
    # 1x1 conv (no bias) == row-wise channel matmul; contract the C_in axis of
    # both operands (trans_b) so the weight needs no wrapper-side transpose.
    acc = lax.dot_general(
        x_ref[...],
        w_ref[...],
        dimension_numbers=(((1,), (1,)), ((), ())),
        preferred_element_type=jnp.float32,
    )
    o_ref[...] = acc.astype(o_ref.dtype)


def transfer_forward(feat_nchw, conv_weight, *, tile_m=512,
                     compute_dtype=jnp.bfloat16):
    """feat_nchw:   (B, C_in, H, W)      -- resnet152 trunk output (NCHW)
       conv_weight: (hidden, C_in, 1, 1) -- Conv2d(2048, hidden, 1, bias=False)
       returns:     (B, H*W, hidden)     -- == .view(-1, hidden, HW).transpose(1, 2)
    """
    B, C_in, H, W = feat_nchw.shape
    hidden = conv_weight.shape[0]
    HW = H * W
    M = B * HW

    # Lane-dense output: pad hidden up to a multiple of 128 (sliced off below).
    hidden_p = max(128, ((hidden + 127) // 128) * 128)

    # Flatten B*HW into the matmul M dimension; cast to bf16 for the MXU.
    # (one relayout op -- see TODO above about emitting NHWC upstream)
    x = jnp.transpose(feat_nchw.reshape(B, C_in, HW), (0, 2, 1))
    x = x.reshape(M, C_in).astype(compute_dtype)

    # Weight: reshape only (no transpose); zero-pad hidden if lane-sparse.
    w = conv_weight.reshape(hidden, C_in)
    if hidden_p != hidden:
        w = jnp.pad(w, ((0, hidden_p - hidden), (0, 0)))
    w = w.astype(compute_dtype)

    # Row tile: multiple of 8 sublanes, capped at tile_m (512 bf16 rows keeps
    # double-buffered VMEM ~<20 MB even at C_in=2048/hidden=768 -> safe on v7x;
    # raise tile_m + vmem_limit_bytes on 128 MiB parts if desired).
    tm = min(tile_m, ((M + 7) // 8) * 8)
    grid = (pl.cdiv(M, tm),)

    out = pl.pallas_call(
        _transfer_kernel,
        out_shape=jax.ShapeDtypeStruct((M, hidden_p), feat_nchw.dtype),
        grid_spec=pltpu.PrefetchScalarGridSpec(
            num_scalar_prefetch=0,
            grid=grid,
            in_specs=[
                pl.BlockSpec((tm, C_in), lambda i: (i, 0)),        # row tile
                pl.BlockSpec((hidden_p, C_in), lambda i: (0, 0)),  # shared weight
            ],
            out_specs=pl.BlockSpec((tm, hidden_p), lambda i: (i, 0)),
        ),
        compiler_params=pltpu.CompilerParams(
            dimension_semantics=("parallel",),   # shards row tiles across v7x's 2 TCs
            vmem_limit_bytes=48 << 20,
        ),
    )(x, w)

    # Drop the hidden padding and restore (B, HW, hidden).
    return out[:, :hidden].reshape(B, HW, hidden)


def transfer_forward_ref(feat_nchw, conv_weight):
    """Pure-JAX reference matching PyTorch semantics exactly (f32)."""
    B, C_in, H, W = feat_nchw.shape
    hidden = conv_weight.shape[0]
    w = conv_weight.reshape(hidden, C_in)                 # (hidden, C_in)
    v2 = jnp.einsum("bchw,oc->bohw", feat_nchw, w)        # 1x1 conv, no bias
    v2 = v2.reshape(B, hidden, H * W)                     # .view
    v2 = jnp.transpose(v2, (0, 2, 1))                     # .transpose(1, 2)
    return v2


if __name__ == "__main__":
    # Small synthetic shapes consistent with the module: backbone spatial 7x7,
    # C_in=64 stand-in for 2048, hidden=32 stand-in for args.hidden_size.
    B, C_in, H, W = 2, 64, 7, 7
    hidden = 32

    key = jax.random.PRNGKey(0)
    k_feat, k_w = jax.random.split(key)
    feat = jax.random.normal(k_feat, (B, C_in, H, W), dtype=jnp.float32)
    conv_w = (jax.random.normal(k_w, (hidden, C_in, 1, 1), dtype=jnp.float32)
              * (1.0 / jnp.sqrt(C_in)))

    out = transfer_forward(feat, conv_w)
    out = jax.block_until_ready(out)

    ref = transfer_forward_ref(feat, conv_w)
    assert out.shape == (B, H * W, hidden), out.shape
    # bf16 inputs with f32 accumulation -> relaxed tolerance.
    assert jnp.allclose(out, ref, atol=2e-2, rtol=2e-2), "mismatch vs reference"

    print("KERNEL_OK")
</pallas_src>

<mosaic_0001>
module attributes {stable_mosaic.version = 11 : i64} {
  func.func @_transfer_kernel(%arg0: i32, %arg1: memref<104x64xbf16, #tpu.memory_space<vmem>>, %arg2: memref<128x64xbf16, #tpu.memory_space<vmem>>, %arg3: memref<104x128xf32, #tpu.memory_space<vmem>>) attributes {dimension_semantics = [#tpu.dimension_semantics<parallel>], iteration_bounds = array<i64: 1>, scalar_prefetch = 0 : i64, scratch_operands = 0 : i64, tpu.core_type = #tpu.core_type<tc>, window_params = [{transform_indices = @transform_0, window_bounds = array<i64: 104, 64>}, {pipeline_mode = #tpu.pipeline_mode<synchronous>, transform_indices = @transform_1, window_bounds = array<i64: 128, 64>}, {transform_indices = @transform_2, window_bounds = array<i64: 104, 128>}]} {
    %c0 = arith.constant 0 : index
    %c0_0 = arith.constant 0 : index
    %0 = vector.load %arg1[%c0, %c0_0] : memref<104x64xbf16, #tpu.memory_space<vmem>>, vector<104x64xbf16>
    %c0_1 = arith.constant 0 : index
    %c0_2 = arith.constant 0 : index
    %1 = vector.load %arg2[%c0_1, %c0_2] : memref<128x64xbf16, #tpu.memory_space<vmem>>, vector<128x64xbf16>
    %cst = arith.constant dense<0.000000e+00> : vector<104x128xf32>
    %2 = tpu.matmul %0, %1, %cst {dimension_numbers = #tpu.dot_dimension_numbers<[1], [1], [0], [0], [0, 0, 1, 0], [], []>} : vector<104x64xbf16>, vector<128x64xbf16>, vector<104x128xf32> -> vector<104x128xf32>
    %c0_3 = arith.constant 0 : index
    %c0_4 = arith.constant 0 : index
    %3 = vector.load %arg3[%c0_3, %c0_4] : memref<104x128xf32, #tpu.memory_space<vmem>>, vector<104x128xf32>
    tpu.vector_store %arg3[%c0_3, %c0_4], %2 {strides = array<i32>} : memref<104x128xf32, #tpu.memory_space<vmem>>, vector<104x128xf32>,
    return
  }
  func.func @transform_0(%arg0: i32) -> (i32, i32) {
    %c0_i32 = arith.constant 0 : i32
    %c0_i32_0 = arith.constant 0 : i32
    return %arg0, %c0_i32 : i32, i32
  }
  func.func @transform_1(%arg0: i32) -> (i32, i32) {
    %c0_i32 = arith.constant 0 : i32
    %c0_i32_0 = arith.constant 0 : i32
    %c0_i32_1 = arith.constant 0 : i32
    return %c0_i32, %c0_i32_0 : i32, i32
  }
  func.func @transform_2(%arg0: i32) -> (i32, i32) {
    %c0_i32 = arith.constant 0 : i32
    %c0_i32_0 = arith.constant 0 : i32
    return %arg0, %c0_i32 : i32, i32
  }
}

</mosaic_0001>

<bundles_post_ra>
// kernel: tpu_custom_call.1
= control target key start
LH: loop header
LB: loop body
LE: loop exit
PB: predicated region body
PF: predicated region fallthrough
CT: control target
= control target key end

     0   :  { %vm114_vm0 = vcmask 523264   ;;  %s445_s0 = inlined_call_operand.vmem [shape: bf16[98,64], index: 0, kind: input, shape index: {}]   ;;  %s446_s1 = inlined_call_operand.vmem [shape: bf16[128,64], index: 1, kind: input, shape index: {}]   ;;  %s447_s2 = inlined_call_operand.hbm [shape: f32[98,128], index: 2, kind: output, shape index: {}]  }
   0x1   :  { %v310_v0 = vld [vmem:[%s446_s1 + $0x38] sm:$0xff] }
   0x2   :  { %7 = vsyncpa [#allocation3], 0  ;;  %v158_v1 = vsel %vm114_vm0, %v310_v0, 0  ;;  %v309_v2 = vld [vmem:[%s446_s1 + $0x30] sm:$0xff]  ;;  %v308_v4 = vld [vmem:[%s446_s1 + $0x28] sm:$0xff]  ;;  %s222_s13 = sshll.u32 %s447_s2, 4  ;;  %s223_s13 = int_to_ptr.hbm [resolvable:$true] %s222_s13 }
   0x3   :  { %160 = vmatpush.bf16.xpose.msra.mxu0 %v158_v1  ;;  %312 = vmatpush.bf16.xpose.msra.mxu2 %v158_v1  ;;  %v155_v3 = vsel %vm114_vm0, %v309_v2, 0  ;;  %v152_v5 = vsel %vm114_vm0, %v308_v4, 0  ;;  %v307_v6 = vld [vmem:[%s446_s1 + $0x20] sm:$0xff]  ;;  %v306_v8 = vld [vmem:[%s446_s1 + $0x18] sm:$0xff]  ;;  %v305_v10 = vld [vmem:[%s446_s1 + $0x10] sm:$0xff]  ;;  %s365_s14 = smov 128  }
   0x4   :  { %313 = vmatpush.bf16.xpose.msra.mxu3 %v158_v1  ;;  %311 = vmatpush.bf16.xpose.msra.mxu1 %v158_v1  ;;  %v149_v7 = vsel %vm114_vm0, %v307_v6, 0  ;;  %v146_v9 = vsel %vm114_vm0, %v306_v8, 0  ;;  %v143_v11 = vsel %vm114_vm0, %v305_v10, 0  ;;  %v304_v12 = vld [vmem:[%s446_s1 + $0x8] sm:$0xff]  ;;  %v303_v14 = vld [vmem:[%s446_s1] sm:$0xff]  ;;  %v300_v17 = vld [vmem:[%s445_s0 + $0x18] sm:$0xff] }
   0x5   :  { %v140_v13 = vsel %vm114_vm0, %v304_v12, 0  ;;  %v137_v15 = vsel %vm114_vm0, %v303_v14, 0  ;;  %v297_v16 = vld [vmem:[%s445_s0] sm:$0xff]  ;;  %v302_v18 = vld [vmem:[%s445_s0 + $0x28] sm:$0xff]  ;;  %v299_v19 = vld [vmem:[%s445_s0 + $0x10] sm:$0xff]  ;;  %s366_s15 = smov 8  }
   0x6   :  { %v24_v20 = vld [vmem:[%s445_s0 + $0x30] sm:$0xf]  ;;  %v298_v22 = vld [vmem:[%s445_s0 + $0x8] sm:$0xff]  ;;  %v301_v23 = vld [vmem:[%s445_s0 + $0x20] sm:$0xff]  ;;  %s364_s0 = smov [#allocation2]  }
   0x7   :  { %v66_v21 = vunpack.c.l.b16 %v24_v20  ;;  %s220_s10 = sshll.u32 %s364_s0, 4  ;;  %s221_s10 = int_to_ptr.vmem [resolvable:$true] %s220_s10 }
   0x9   :  { %v73_v24 = vpack.c.b16 %v66_v21, %v66_v21 }
   0xb   :  { %161 = vmatpush.bf16.xpose.msra.mxu0 %v155_v3  ;;  %315 = vmatpush.bf16.xpose.msra.mxu2 %v155_v3 }
   0xc   :  { %316 = vmatpush.bf16.xpose.msra.mxu3 %v155_v3  ;;  %314 = vmatpush.bf16.xpose.msra.mxu1 %v155_v3 }
  0x13   :  { %162 = vmatpush.bf16.xpose.msra.mxu0 %v152_v5  ;;  %318 = vmatpush.bf16.xpose.msra.mxu2 %v152_v5 }
  0x14   :  { %319 = vmatpush.bf16.xpose.msra.mxu3 %v152_v5  ;;  %317 = vmatpush.bf16.xpose.msra.mxu1 %v152_v5 }
  0x1b   :  { %163 = vmatpush.bf16.xpose.msra.mxu0 %v149_v7  ;;  %321 = vmatpush.bf16.xpose.msra.mxu2 %v149_v7 }
  0x1c   :  { %322 = vmatpush.bf16.xpose.msra.mxu3 %v149_v7  ;;  %320 = vmatpush.bf16.xpose.msra.mxu1 %v149_v7 }
  0x23   :  { %164 = vmatpush.bf16.xpose.msra.mxu0 %v146_v9  ;;  %324 = vmatpush.bf16.xpose.msra.mxu2 %v146_v9 }
  0x24   :  { %325 = vmatpush.bf16.xpose.msra.mxu3 %v146_v9  ;;  %323 = vmatpush.bf16.xpose.msra.mxu1 %v146_v9 }
  0x2b   :  { %165 = vmatpush.bf16.xpose.msra.mxu0 %v143_v11  ;;  %327 = vmatpush.bf16.xpose.msra.mxu2 %v143_v11 }
  0x2c   :  { %328 = vmatpush.bf16.xpose.msra.mxu3 %v143_v11  ;;  %326 = vmatpush.bf16.xpose.msra.mxu1 %v143_v11 }
  0x33   :  { %166 = vmatpush.bf16.xpose.msra.mxu0 %v140_v13  ;;  %330 = vmatpush.bf16.xpose.msra.mxu2 %v140_v13 }
  0x34   :  { %331 = vmatpush.bf16.xpose.msra.mxu3 %v140_v13  ;;  %329 = vmatpush.bf16.xpose.msra.mxu1 %v140_v13 }
  0x3b   :  { %167 = vmatpush.bf16.xpose.msra.mxu0 %v137_v15  ;;  %333 = vmatpush.bf16.xpose.msra.mxu2 %v137_v15 }
  0x3c   :  { %334 = vmatpush.bf16.xpose.msra.mxu3 %v137_v15  ;;  %332 = vmatpush.bf16.xpose.msra.mxu1 %v137_v15 }
  0x42   :  { %290 = vmatmul.msk.bf16.vlgmr.msra.gmra.mxu0 %vm114_vm0, %v297_v16  ;;  %293 = vmatmul.msk.bf16.vlgmr.msra.gmra.mxu2 %vm114_vm0, %v300_v17 }
  0x43   :  { %295 = vmatmul.msk.bf16.vlgmr.msra.gmra.mxu3 %vm114_vm0, %v302_v18  ;;  %292 = vmatmul.msk.bf16.vlgmr.msra.gmra.mxu1 %vm114_vm0, %v299_v19 }
  0x52   :  { %291 = vmatmul.msk.bf16.gmra.mxu0 %vm114_vm0, %v298_v22  ;;  %294 = vmatmul.msk.bf16.gmra.mxu2 %vm114_vm0, %v301_v23 }
  0x53   :  { %296 = vmatmul.msk.bf16.gmra.mxu3 %vm114_vm0, %v73_v24 }
  0xbf   :  { %v169_v25 = vpop.f32.mrf.mxu0 }
  0xc0   :  { %203 = vst [vmem:[#allocation2] sm:$0xff] %v169_v25  ;;  %v179_v26 = vpop.f32.mrf.mxu1 }
  0xc1   :  { %207 = vst [vmem:[#allocation2 + $0x20] sm:$0xff] %v179_v26 }
  0xc5   :  { %v184_v27 = vpop.f32.mrf.mxu2 }
  0xc6   :  { %209 = vst [vmem:[#allocation2 + $0x30] sm:$0xff] %v184_v27  ;;  %v194_v28 = vpop.f32.mrf.mxu3 }
  0xc7   :  { %213 = vst [vmem:[#allocation2 + $0x50] sm:$0xff] %v194_v28  ;;  %v171_v29 = vpop.f32.mrf.mxu0 }
  0xc8   :  { %204 = vst [vmem:[#allocation2 + $0x8] sm:$0xff] %v171_v29  ;;  %v181_v30 = vpop.f32.mrf.mxu1 }
  0xc9   :  { %208 = vst [vmem:[#allocation2 + $0x28] sm:$0xff] %v181_v30 }
  0xcd   :  { %v186_v31 = vpop.f32.mrf.mxu2 }
  0xce   :  { %210 = vst [vmem:[#allocation2 + $0x38] sm:$0xff] %v186_v31  ;;  %v196_v32 = vpop.f32.mrf.mxu3 }
  0xcf   :  { %214 = vst [vmem:[#allocation2 + $0x58] sm:$0xff] %v196_v32  ;;  %v174_v33 = vpop.f32.mrf.mxu0 }
  0xd0   :  { %205 = vst [vmem:[#allocation2 + $0x10] sm:$0xff] %v174_v33 }
  0xd5   :  { %v189_v34 = vpop.f32.mrf.mxu2 }
  0xd6   :  { %211 = vst [vmem:[#allocation2 + $0x40] sm:$0xff] %v189_v34  ;;  %v199_v35 = vpop.f32.mrf.mxu3 }
  0xd7   :  { %215 = vst [vmem:[#allocation2 + $0x60] sm:$0xff] %v199_v35  ;;  %v176_v36 = vpop.f32.mrf.mxu0 }
  0xd8   :  { %206 = vst [vmem:[#allocation2 + $0x18] sm:$0xff] %v176_v36 }
  0xdd   :  { %v191_v37 = vpop.f32.mrf.mxu2 }
  0xde   :  { %212 = vst [vmem:[#allocation2 + $0x48] sm:$0xff] %v191_v37  ;;  %v201_v38 = vpop.f32.mrf.mxu3 }
  0xdf   :  { %228 = dma.vmem_to_hbm [thread:$0]  %s221_s10, 1664, %s223_s13, [#allocation3], %s365_s14, %s365_s14, %s366_s15  }
  0xe0   :  { %362 = dma.done.wait [#allocation3], 1664  }
  0xe1   :  { %363 = vsyncadd [#allocation3], 4294965632 }
  0xe2   :  { %233 = vsyncpa [#allocation3], 1 }

</bundles_post_ra>
